<compile_context>
chip_gen: v6e
topology: v6e:2x2x1
jax: 0.10.0
libtpu: 0.0.40
codegen_flags: <defaults>
</compile_context>

<pallas_src>
import math

import jax
import jax.numpy as jnp
from jax.experimental import pallas as pl
from jax.experimental.pallas import tpu as pltpu


def _round_up(x: int, m: int) -> int:
    return (x + m - 1) // m * m


def _pick_divisor_tile(dim_pad: int, unit: int, max_tile: int) -> int:
    """Largest tile = unit*d such that d divides (dim_pad//unit) and tile <= max_tile.

    dim_pad is already a multiple of `unit`, so this always returns a tile that
    divides dim_pad exactly -> no extra zero padding beyond the hardware minimum.
    """
    q = dim_pad // unit
    dmax = max(1, max_tile // unit)
    best = 1
    for d in range(1, min(q, dmax) + 1):
        if q % d == 0:
            best = d
    return unit * best


# ----------------------------------------------------------------------------
# Kernels
# ----------------------------------------------------------------------------
def _mm_acc_kernel(x_ref, wt_ref, o_ref, acc_ref):
    # x_ref: (tm, tk) bf16, wt_ref: (tk, tn) bf16, o_ref: (tm, tn) bf16,
    # acc_ref: (tm, tn) f32 scratch persisting across the K grid axis.
    @pl.when(pl.program_id(2) == 0)
    def _():
        acc_ref[...] = jnp.zeros_like(acc_ref)

    acc_ref[...] += jnp.dot(
        x_ref[...], wt_ref[...], preferred_element_type=jnp.float32
    )

    @pl.when(pl.program_id(2) == pl.num_programs(2) - 1)
    def _():
        o_ref[...] = acc_ref[...].astype(o_ref.dtype)


def _mm_single_k_kernel(x_ref, wt_ref, o_ref):
    # K fits in one tile: no accumulator round-trip, no init/finalize.
    o_ref[...] = jnp.dot(
        x_ref[...], wt_ref[...], preferred_element_type=jnp.float32
    ).astype(o_ref.dtype)


def _compact_matmul(x2_pad, wt_pad, tm, tn, tk):
    """(m_pad, k_pad) bf16 @ (k_pad, n_pad) bf16 -> (m_pad, n_pad) bf16."""
    m_pad, k_pad = x2_pad.shape
    _, n_pad = wt_pad.shape
    nk = k_pad // tk

    # Tile VMEM footprint (double-buffered inputs/outputs + f32 accumulator).
    vmem_bytes = 2 * (tm * tk * 2 + tk * tn * 2 + tm * tn * 2)
    if nk > 1:
        vmem_bytes += tm * tn * 4
    vmem_limit = int(min(max(vmem_bytes * 2 + (2 << 20), 32 << 20), 64 << 20))

    if nk == 1:
        return pl.pallas_call(
            _mm_single_k_kernel,
            out_shape=jax.ShapeDtypeStruct((m_pad, n_pad), jnp.bfloat16),
            grid_spec=pltpu.PrefetchScalarGridSpec(
                num_scalar_prefetch=0,
                grid=(m_pad // tm, n_pad // tn),
                in_specs=[
                    pl.BlockSpec((tm, k_pad), lambda i, j: (i, 0)),
                    pl.BlockSpec((k_pad, tn), lambda i, j: (0, j)),
                ],
                out_specs=pl.BlockSpec((tm, tn), lambda i, j: (i, j)),
            ),
            compiler_params=pltpu.CompilerParams(
                dimension_semantics=("parallel", "parallel"),
                vmem_limit_bytes=vmem_limit,
            ),
        )(x2_pad, wt_pad)

    return pl.pallas_call(
        _mm_acc_kernel,
        out_shape=jax.ShapeDtypeStruct((m_pad, n_pad), jnp.bfloat16),
        grid_spec=pltpu.PrefetchScalarGridSpec(
            num_scalar_prefetch=0,
            grid=(m_pad // tm, n_pad // tn, nk),
            in_specs=[
                pl.BlockSpec((tm, tk), lambda i, j, k: (i, k)),
                pl.BlockSpec((tk, tn), lambda i, j, k: (k, j)),
            ],
            out_specs=pl.BlockSpec((tm, tn), lambda i, j, k: (i, j)),
            scratch_shapes=[pltpu.VMEM((tm, tn), jnp.float32)],
        ),
        compiler_params=pltpu.CompilerParams(
            # Reduction axis last & arbitrary; M/N parallel (megacore / 2-TC).
            dimension_semantics=("parallel", "parallel", "arbitrary"),
            vmem_limit_bytes=vmem_limit,
        ),
    )(x2_pad, wt_pad)


# ----------------------------------------------------------------------------
# Module-level wrappers
# ----------------------------------------------------------------------------
def prepare_pruned_weight(w_pruned):
    """One-time weight prep (call at pruning time, NOT per forward).

    w_pruned: (kept, in_features) -> (k_pad, n_pad) bf16, already transposed
    to (IN, KEPT) layout and zero-padded to (8,128)-friendly multiples of 128.
    """
    kept, in_features = w_pruned.shape
    k_pad = _round_up(in_features, 128)
    n_pad = _round_up(kept, 128)
    wt = jnp.zeros((k_pad, n_pad), dtype=jnp.bfloat16)
    wt = wt.at[:in_features, :kept].set(
        jnp.transpose(w_pruned).astype(jnp.bfloat16)
    )
    return wt


def pruned_output_linear(x, wt_prepared, kept_idx, out_features,
                         *, tm_max=1024, tn_max=1024, tk_max=512):
    """Forward pass of L1PrunedOutputLinear.

    x:            (..., in_features)                 any float dtype
    wt_prepared:  (k_pad, n_pad) bf16                from prepare_pruned_weight
    kept_idx:     (kept,) int32                      sorted kept output indices
    returns:      (..., out_features) bf16           zeros at pruned positions
    """
    *lead, in_features = x.shape
    kept = int(kept_idx.shape[0])
    M = math.prod(lead) if lead else 1
    k_pad, n_pad = wt_prepared.shape

    # M padding: bf16 packs 16 rows per sublane tile.
    m_pad = _round_up(M, 16)
    if m_pad <= tm_max:
        # Single M block -> the weight streams from HBM exactly once.
        tm = m_pad
    else:
        tm = 512
        m_pad = _round_up(M, tm)

    # Tiles chosen as exact divisors of the (minimally) padded dims.
    tk = _pick_divisor_tile(k_pad, 128, tk_max)
    tn = _pick_divisor_tile(n_pad, 128, tn_max)

    x2 = x.reshape(M, in_features).astype(jnp.bfloat16)
    x2 = jnp.pad(x2, ((0, m_pad - M), (0, k_pad - in_features)))

    y = _compact_matmul(x2, wt_prepared, tm, tn, tk)
    y = y[:M, :kept]                                  # drop pad rows/cols

    # Cheap column scatter in XLA: only M*kept bf16 bytes move; pruned output
    # columns remain exactly 0.0 in the bf16 zeros buffer.
    out = jnp.zeros((M, out_features), dtype=jnp.bfloat16)
    out = out.at[:, kept_idx].set(y)
    return out.reshape(*lead, out_features)


def build_pruned_params(key, in_features, out_features, compression_ratio):
    """Deterministic synthetic 'linear.weight' + L1 pruning (module __init__)."""
    W = jax.random.normal(key, (out_features, in_features), dtype=jnp.float32)
    kept = max(out_features - int(out_features * compression_ratio), 1)
    l1 = jnp.abs(W).sum(axis=1)
    _, idx = jax.lax.top_k(l1, kept)
    kept_idx = jnp.sort(idx)
    w_pruned = W[kept_idx, :]
    return W, w_pruned, kept_idx


if __name__ == "__main__":
    key = jax.random.PRNGKey(0)
    k_w, k_x = jax.random.split(key)

    batch, seq, in_features, out_features = 2, 8, 32, 32
    compression_ratio = 0.25

    W, w_pruned, kept_idx = build_pruned_params(
        k_w, in_features, out_features, compression_ratio
    )
    x = jax.random.normal(k_x, (batch, seq, in_features), dtype=jnp.float32)

    # One-time weight preparation (hoisted out of the per-forward path).
    wt_prepared = prepare_pruned_weight(w_pruned)

    out = pruned_output_linear(x, wt_prepared, kept_idx, out_features)
    out = jax.block_until_ready(out)

    # Pure-JAX reference of the PyTorch forward (f32 compute, cast to bf16,
    # scatter into a zero bf16 output).  Kernel uses bf16 MXU operands with
    # f32 accumulation, so compare with bf16-level tolerance.
    y_ref = (x.reshape(-1, in_features) @ w_pruned.T).astype(jnp.bfloat16)
    ref = jnp.zeros((batch * seq, out_features), dtype=jnp.bfloat16)
    ref = ref.at[:, kept_idx].set(y_ref).reshape(batch, seq, out_features)

    assert out.shape == (batch, seq, out_features)
    assert out.dtype == jnp.bfloat16
    assert jnp.allclose(
        out.astype(jnp.float32), ref.astype(jnp.float32), atol=1e-1, rtol=5e-2
    ), "mismatch vs reference"
    # Pruned output columns must be exactly zero.
    pruned_mask = jnp.ones((out_features,), bool).at[kept_idx].set(False)
    assert jnp.all(out.astype(jnp.float32)[..., pruned_mask] == 0.0)

    print("KERNEL_OK")
</pallas_src>

<mosaic_0001>
module attributes {stable_mosaic.version = 11 : i64} {
  func.func @_mm_single_k_kernel(%arg0: i32, %arg1: i32, %arg2: memref<16x128xbf16, #tpu.memory_space<vmem>>, %arg3: memref<128x128xbf16, #tpu.memory_space<vmem>>, %arg4: memref<16x128xbf16, #tpu.memory_space<vmem>>) attributes {dimension_semantics = [#tpu.dimension_semantics<parallel>, #tpu.dimension_semantics<parallel>], iteration_bounds = array<i64: 1, 1>, scalar_prefetch = 0 : i64, scratch_operands = 0 : i64, tpu.core_type = #tpu.core_type<tc>, window_params = [{transform_indices = @transform_0, window_bounds = array<i64: 16, 128>}, {transform_indices = @transform_1, window_bounds = array<i64: 128, 128>}, {transform_indices = @transform_2, window_bounds = array<i64: 16, 128>}]} {
    %c0 = arith.constant 0 : index
    %c0_0 = arith.constant 0 : index
    %0 = vector.load %arg2[%c0, %c0_0] : memref<16x128xbf16, #tpu.memory_space<vmem>>, vector<16x128xbf16>
    %c0_1 = arith.constant 0 : index
    %c0_2 = arith.constant 0 : index
    %1 = vector.load %arg3[%c0_1, %c0_2] : memref<128x128xbf16, #tpu.memory_space<vmem>>, vector<128x128xbf16>
    %cst = arith.constant dense<0.000000e+00> : vector<16x128xf32>
    %2 = tpu.matmul %0, %1, %cst {dimension_numbers = #tpu.dot_dimension_numbers<[1], [0], [0], [1], [0, 0, 1, 1], [], []>} : vector<16x128xbf16>, vector<128x128xbf16>, vector<16x128xf32> -> vector<16x128xf32>
    %3 = arith.truncf %2 : vector<16x128xf32> to vector<16x128xbf16>
    %c0_3 = arith.constant 0 : index
    %c0_4 = arith.constant 0 : index
    %4 = vector.load %arg4[%c0_3, %c0_4] : memref<16x128xbf16, #tpu.memory_space<vmem>>, vector<16x128xbf16>
    tpu.vector_store %arg4[%c0_3, %c0_4], %3 {strides = array<i32>} : memref<16x128xbf16, #tpu.memory_space<vmem>>, vector<16x128xbf16>,
    return
  }
  func.func @transform_0(%arg0: i32, %arg1: i32) -> (i32, i32) {
    %c0_i32 = arith.constant 0 : i32
    %c0_i32_0 = arith.constant 0 : i32
    return %arg0, %c0_i32 : i32, i32
  }
  func.func @transform_1(%arg0: i32, %arg1: i32) -> (i32, i32) {
    %c0_i32 = arith.constant 0 : i32
    %c0_i32_0 = arith.constant 0 : i32
    return %c0_i32, %arg1 : i32, i32
  }
  func.func @transform_2(%arg0: i32, %arg1: i32) -> (i32, i32) {
    %c0_i32 = arith.constant 0 : i32
    return %arg0, %arg1 : i32, i32
  }
}

</mosaic_0001>

<bundles_post_ra>
// kernel: tpu_custom_call.1
= control target key start
LH: loop header
LB: loop body
LE: loop exit
PB: predicated region body
PF: predicated region fallthrough
CT: control target
= control target key end

     0   :  { %7 = vsyncpa [#allocation3], 0  ;;  %s351_s0 = inlined_call_operand.hbm [shape: bf16[16,128], index: 0, kind: input, shape index: {}]   ;;  %s352_s1 = inlined_call_operand.hbm [shape: bf16[128,128], index: 1, kind: input, shape index: {}]   ;;  %s353_s2 = inlined_call_operand.hbm [shape: bf16[16,128], index: 2, kind: output, shape index: {}]  }
   0x1   :  { %8 = vsyncpa [#allocation6], 0 }
   0x2   :  { %9 = vsyncpa [#allocation4], 0  ;;  %s311_s9 = smov [#allocation2]  }
   0x3   :  { %s15_s10 = sshll.u32 %s311_s9, 4  ;;  %s16_s10 = int_to_ptr.vmem [resolvable:$true] %s15_s10 }
   0x4   :  { %s253_s11 = scalar_lea.vmem %s16_s10, 128  ;;  %p258_p1 = scmp.lt.s32.totalorder %s16_s10, %s16_s10 }
   0x5   :  { %p254_p0 = scmp.ne.s32.totalorder %s16_s10, %s253_s11  ;;  %p259_p2 = scmp.lt.s32.totalorder %s253_s11, %s253_s11 }
   0x7   :  { %p260_p3 = por %p259_p2, %p258_p1 }
   0x9   :  { %p261_p4 = pnand %p260_p3, %p254_p0 }
   0xb   :  { %264 = shalt.err (!%p261_p4)
}
   0xc   :  { %s312_s12 = smov 64   ;;  %s313_s13 = smov 4  }
   0xd   :  { %21 = dma.hbm_to_vmem [thread:$0]  %s351_s0, 128, %s16_s10, [#allocation3], %s312_s12, %s312_s12, %s313_s13  }
   0xe   :  { %s314_s16 = smov [#allocation5]  }
   0xf   :  { %s27_s17 = sshll.u32 %s314_s16, 4  ;;  %s28_s17 = int_to_ptr.vmem [resolvable:$true] %s27_s17 }
  0x10   :  { %s273_s18 = scalar_lea.vmem %s28_s17, 1024  ;;  %p278_p6 = scmp.lt.s32.totalorder %s28_s17, %s28_s17 }
  0x11   :  { %p274_p5 = scmp.ne.s32.totalorder %s28_s17, %s273_s18  ;;  %p279_p7 = scmp.lt.s32.totalorder %s273_s18, %s273_s18 }
  0x13   :  { %p280_p8 = por %p279_p7, %p278_p6 }
  0x15   :  { %p281_p9 = pnand %p280_p8, %p274_p5 }
  0x17   :  { %284 = shalt.err (!%p281_p9)
}
  0x18   :  { %33 = dma.hbm_to_vmem [thread:$0]  %s352_s1, 1024, %s28_s17, [#allocation6], %s312_s12, %s312_s12, %s313_s13  }
  0x19   :  { %305 = dma.done.wait [#allocation3], 128  }
  0x1a   :  { %306 = vsyncadd [#allocation3], 4294967168 }
  0x1b   :  { %307 = dma.done.wait [#allocation6], 1024  }
  0x1c   :  { %308 = vsyncadd [#allocation6], 4294966272  ;;  %v315_v0 = vmov 0.0   ;;  %vm316_vm0 = vmmov 0   ;;  %v236_v1 = vld [vmem:[#allocation5 + $0x38] sm:$0xff]   ;;  %v237_v2 = vld [vmem:[#allocation5 + $0x30] sm:$0xff]  }
  0x1d   :  { %209 = vmatprep.subr.bf16.mxu0 %v315_v0  ;;  %225 = vmatprep.mubr.msk.bf16.mxu0 %vm316_vm0, %v315_v0  ;;  %v238_v3 = vld [vmem:[#allocation5 + $0x28] sm:$0xff]   ;;  %v239_v4 = vld [vmem:[#allocation5 + $0x20] sm:$0xff]   ;;  %v240_v5 = vld [vmem:[#allocation5 + $0x18] sm:$0xff]   ;;  %s317_s0 = smov [#allocation7]  }
  0x1e   :  { %210 = vmatpush3.bf16.msra.mxu0 %v236_v1  ;;  %v241_v6 = vld [vmem:[#allocation5 + $0x10] sm:$0xff]   ;;  %v242_v7 = vld [vmem:[#allocation5 + $0x8] sm:$0xff]   ;;  %v243_v8 = vld [vmem:[#allocation5] sm:$0xff]   ;;  %s169_s1 = sshll.u32 %s317_s0, 4  ;;  %s170_s1 = int_to_ptr.vmem [resolvable:$true] %s169_s1 }
  0x1f   :  { %211 = vmatprep.subr.bf16.mxu0 %v315_v0  ;;  %v244_v9 = vld [vmem:[#allocation2] sm:$0xff]   ;;  %s285_s21 = scalar_lea.vmem %s170_s1, 128  ;;  %p290_p11 = scmp.lt.s32.totalorder %s170_s1, %s170_s1 }
  0x20   :  { %p286_p10 = scmp.ne.s32.totalorder %s170_s1, %s285_s21  ;;  %p291_p12 = scmp.lt.s32.totalorder %s285_s21, %s285_s21 }
  0x22   :  { %212 = vmatpush3.bf16.msra.mxu0 %v237_v2  ;;  %p292_p13 = por %p291_p12, %p290_p11 }
  0x23   :  { %213 = vmatprep.subr.bf16.mxu0 %v315_v0 }
  0x24   :  { %p293_p0 = pnand %p292_p13, %p286_p10 }
  0x26   :  { %214 = vmatpush3.bf16.msra.mxu0 %v238_v3 }
  0x27   :  { %215 = vmatprep.subr.bf16.mxu0 %v315_v0 }
  0x2a   :  { %216 = vmatpush3.bf16.msra.mxu0 %v239_v4 }
  0x2b   :  { %217 = vmatprep.subr.bf16.mxu0 %v315_v0 }
  0x2e   :  { %218 = vmatpush3.bf16.msra.mxu0 %v240_v5 }
  0x2f   :  { %219 = vmatprep.subr.bf16.mxu0 %v315_v0 }
  0x32   :  { %220 = vmatpush3.bf16.msra.mxu0 %v241_v6 }
  0x33   :  { %221 = vmatprep.subr.bf16.mxu0 %v315_v0 }
  0x36   :  { %222 = vmatpush3.bf16.msra.mxu0 %v242_v7 }
  0x37   :  { %223 = vmatprep.subr.bf16.mxu0 %v315_v0 }
  0x3a   :  { %224 = vmatpush3.bf16.msra.mxu0 %v243_v8 }
  0x3d   :  { %226 = vmatmul.mubr.bf16.vlgmr.msra.gmra.mxu0 %v244_v9 }
  0xfd   :  { %v147_v10 = vpop.f32.mrf.mxu0 }
  0xff   :  { %v227_v11 = vpop.f32.mrf.mxu0 }
 0x101   :  { %v150_v12 = vpop.f32.mrf.mxu0 }
 0x102   :  { %v198_v13 = vpack.c.bf16 %v150_v12, %v147_v10 }
 0x103   :  { %v228_v14 = vpop.f32.mrf.mxu0 }
 0x104   :  { %199 = vst [vmem:[#allocation7] sm:$0xff] %v198_v13  }
 0x105   :  { %296 = shalt.err (!%p293_p0)
}
 0x106   :  { %175 = dma.vmem_to_hbm [thread:$0]  %s170_s1, 128, %s353_s2, [#allocation4], %s312_s12, %s312_s12, %s313_s13  }
 0x107   :  { %309 = dma.done.wait [#allocation4], 128  }
 0x108   :  { %310 = vsyncadd [#allocation4], 4294967168 }
 0x109   :  { %179 = vsyncpa [#allocation3], 1 }
 0x10a   :  { %180 = vsyncpa [#allocation6], 1 }
 0x10b   :  { %181 = vsyncpa [#allocation4], 1 }

</bundles_post_ra>
